<compile_context>
chip_gen: v6e
topology: v6e:2x2x1
jax: 0.10.0
libtpu: 0.0.40
codegen_flags: <defaults>
</compile_context>

<pallas_src>
import jax
import jax.numpy as jnp
from jax.experimental import pallas as pl
from jax.experimental.pallas import tpu as pltpu

# Model hyper-parameters (consistent with the module: d and input_size)
D = 16                  # latent dim d
INPUT_SIZE = 64         # flattened input size (1 x 8 x 8 image)
HIDDEN = D * D          # d**2 = 256


def _round_up(n, m):
    return ((n + m - 1) // m) * m


def vae_kernel(x_ref,
               w1_ref, b1_ref,          # encoder Linear(input_size, d^2)
               w2_ref, b2_ref,          # encoder Linear(d^2, 2*d)
               w23_ref, b23_ref,        # folded (eval-mode) decoder Linear(d^2 -> d^2)
               w4_ref, b4_ref,          # decoder Linear(d^2, input_size)
               recon_ref, p_ref):
    """One batch tile of the VAE forward (encoder -> split -> decoder)."""
    x = x_ref[...]                                            # (tb, input_size) bf16

    # ---- encoder: Linear -> ReLU ----
    h = jnp.dot(x, w1_ref[...], preferred_element_type=jnp.float32) + b1_ref[...]
    h = jnp.maximum(h, 0.0)                                   # (tb, d^2) f32
    h_bf = h.astype(jnp.bfloat16)                             # bf16 feed for MXU

    # ---- encoder head: p = [mean_z | log_var_z], written as one dense slab ----
    p = jnp.dot(h_bf, w2_ref[...], preferred_element_type=jnp.float32) + b2_ref[...]
    p_ref[...] = p                                            # (tb, 2*d)

    # ---- decoder (eval mode, folded through z == mean_z) ----
    h2 = jnp.dot(h_bf, w23_ref[...], preferred_element_type=jnp.float32) + b23_ref[...]
    h2 = jnp.maximum(h2, 0.0)                                 # (tb, d^2) f32
    recon = jnp.dot(h2.astype(jnp.bfloat16), w4_ref[...],
                    preferred_element_type=jnp.float32) + b4_ref[...]
    recon_ref[...] = recon                                    # (tb, input_size)


def init_params(key):
    """PyTorch-style init: U(-1/sqrt(fan_in), 1/sqrt(fan_in)).

    Weights stored as (in_features, out_features) = W_pytorch.T.
    Biases stored as (1, out_features) for clean lane broadcasting.
    """
    def linear(k, fan_in, fan_out):
        kw, kb = jax.random.split(k)
        bound = 1.0 / jnp.sqrt(jnp.float32(fan_in))
        w = jax.random.uniform(kw, (fan_in, fan_out), jnp.float32, -bound, bound)
        b = jax.random.uniform(kb, (1, fan_out), jnp.float32, -bound, bound)
        return w, b

    k1, k2, k3, k4 = jax.random.split(key, 4)
    w1, b1 = linear(k1, INPUT_SIZE, HIDDEN)    # encoder Linear(input_size, d^2)
    w2, b2 = linear(k2, HIDDEN, 2 * D)         # encoder Linear(d^2, 2*d)
    w3, b3 = linear(k3, D, HIDDEN)             # decoder Linear(d, d^2)
    w4, b4 = linear(k4, HIDDEN, INPUT_SIZE)    # decoder Linear(d^2, input_size)
    return (w1, b1, w2, b2, w3, b3, w4, b4)


def _fold_decoder(w2, b2, w3, b3):
    """Eval-mode fold: decoder's first Linear applied directly to h (z == mean_z)."""
    w23 = jnp.dot(w2[:, :D], w3, preferred_element_type=jnp.float32)        # (d^2, d^2)
    b23 = jnp.dot(b2[:, :D], w3, preferred_element_type=jnp.float32) + b3   # (1, d^2)
    return w23, b23


@jax.jit
def vae_forward(x, params):
    w1, b1, w2, b2, w3, b3, w4, b4 = params
    w23, b23 = _fold_decoder(w2, b2, w3, b3)

    # x.view(-1, input_size)
    x_flat = x.reshape(-1, INPUT_SIZE).astype(jnp.float32)
    B = x_flat.shape[0]

    # Batch tile: multiple of 8 (f32 sublane), capped at 256 to fill the MXU M
    # dimension on v6e/v7x while keeping per-block VMEM tiny.
    tb = min(256, _round_up(B, 8))
    B_pad = _round_up(B, tb)
    if B_pad != B:
        x_flat = jnp.pad(x_flat, ((0, B_pad - B), (0, 0)))

    # bf16 MXU feeds; biases stay f32 (accumulation is f32 via preferred_element_type).
    xb = x_flat.astype(jnp.bfloat16)
    w1b = w1.astype(jnp.bfloat16)
    w2b = w2.astype(jnp.bfloat16)
    w23b = w23.astype(jnp.bfloat16)
    w4b = w4.astype(jnp.bfloat16)

    grid = (B_pad // tb,)

    def row_spec(cols):
        return pl.BlockSpec((tb, cols), lambda i: (i, 0))

    def const_spec(shape):
        # Full-array block + constant index_map -> resident in VMEM across grid steps.
        return pl.BlockSpec(shape, lambda i: (0, 0))

    recon, p = pl.pallas_call(
        vae_kernel,
        out_shape=(
            jax.ShapeDtypeStruct((B_pad, INPUT_SIZE), jnp.float32),  # decoder(z)
            jax.ShapeDtypeStruct((B_pad, 2 * D), jnp.float32),       # [mean | logvar]
        ),
        grid=grid,
        in_specs=[
            row_spec(INPUT_SIZE),                       # x
            const_spec((INPUT_SIZE, HIDDEN)),           # w1
            const_spec((1, HIDDEN)),                    # b1
            const_spec((HIDDEN, 2 * D)),                # w2
            const_spec((1, 2 * D)),                     # b2
            const_spec((HIDDEN, HIDDEN)),               # w23 (folded)
            const_spec((1, HIDDEN)),                    # b23 (folded)
            const_spec((HIDDEN, INPUT_SIZE)),           # w4
            const_spec((1, INPUT_SIZE)),                # b4
        ],
        out_specs=(row_spec(INPUT_SIZE), row_spec(2 * D)),
        compiler_params=pltpu.CompilerParams(
            dimension_semantics=("parallel",),          # shard batch tiles over TCs
        ),
    )(xb, w1b, b1, w2b, b2, w23b, b23, w4b, b4)

    recon = recon[:B]
    p = p[:B]
    mean_z = p[:, :D]
    log_var_z = p[:, D:]
    return recon, mean_z, log_var_z


def reference_forward_f32(x, params):
    """Full-precision pure-JAX reference of the original module (eval mode)."""
    w1, b1, w2, b2, w3, b3, w4, b4 = params
    xf = x.reshape(-1, INPUT_SIZE).astype(jnp.float32)
    h = jnp.maximum(xf @ w1 + b1, 0.0)
    p = h @ w2 + b2
    mean_z, log_var_z = p[:, :D], p[:, D:]
    z = mean_z                                   # eval mode
    h2 = jnp.maximum(z @ w3 + b3, 0.0)
    recon = h2 @ w4 + b4
    return recon, mean_z, log_var_z


def reference_forward_bf16(x, params):
    """Pure-JAX reference that mirrors the kernel's exact math (bf16 feeds + fold)."""
    w1, b1, w2, b2, w3, b3, w4, b4 = params
    w23, b23 = _fold_decoder(w2, b2, w3, b3)
    xb = x.reshape(-1, INPUT_SIZE).astype(jnp.bfloat16)
    h = jnp.maximum(
        jnp.dot(xb, w1.astype(jnp.bfloat16), preferred_element_type=jnp.float32) + b1, 0.0)
    hb = h.astype(jnp.bfloat16)
    p = jnp.dot(hb, w2.astype(jnp.bfloat16), preferred_element_type=jnp.float32) + b2
    h2 = jnp.maximum(
        jnp.dot(hb, w23.astype(jnp.bfloat16), preferred_element_type=jnp.float32) + b23, 0.0)
    recon = jnp.dot(h2.astype(jnp.bfloat16), w4.astype(jnp.bfloat16),
                    preferred_element_type=jnp.float32) + b4
    return recon, p[:, :D], p[:, D:]


if __name__ == "__main__":
    key = jax.random.PRNGKey(0)
    k_x, k_p = jax.random.split(key)

    # NCHW image input, flattened to input_size = 1*8*8 = 64 inside forward
    x = jax.random.normal(k_x, (8, 1, 8, 8), dtype=jnp.float32)
    params = init_params(k_p)

    recon, mean_z, log_var_z = vae_forward(x, params)
    jax.block_until_ready((recon, mean_z, log_var_z))

    assert recon.shape == (8, INPUT_SIZE)
    assert mean_z.shape == (8, D) and log_var_z.shape == (8, D)

    # 1) Kernel correctness: match a pure-JAX model of the exact kernel math.
    r_k, m_k, lv_k = reference_forward_bf16(x, params)
    assert jnp.allclose(recon, r_k, atol=1e-3, rtol=1e-3)
    assert jnp.allclose(mean_z, m_k, atol=1e-3, rtol=1e-3)
    assert jnp.allclose(log_var_z, lv_k, atol=1e-3, rtol=1e-3)

    # 2) Semantic fidelity: close to the full-f32 original-module forward
    #    (looser tolerance because of bf16 MXU feeds).
    r_f, m_f, lv_f = reference_forward_f32(x, params)
    assert jnp.allclose(recon, r_f, atol=3e-2, rtol=3e-2)
    assert jnp.allclose(mean_z, m_f, atol=3e-2, rtol=3e-2)
    assert jnp.allclose(log_var_z, lv_f, atol=3e-2, rtol=3e-2)

    print("KERNEL_OK")
</pallas_src>

<mosaic_0001>
module attributes {stable_mosaic.version = 11 : i64} {
  func.func @vae_kernel(%arg0: i32, %arg1: memref<8x64xbf16, #tpu.memory_space<vmem>>, %arg2: memref<64x256xbf16, #tpu.memory_space<vmem>>, %arg3: memref<1x256xf32, #tpu.memory_space<vmem>>, %arg4: memref<256x32xbf16, #tpu.memory_space<vmem>>, %arg5: memref<1x32xf32, #tpu.memory_space<vmem>>, %arg6: memref<256x256xbf16, #tpu.memory_space<vmem>>, %arg7: memref<1x256xf32, #tpu.memory_space<vmem>>, %arg8: memref<256x64xbf16, #tpu.memory_space<vmem>>, %arg9: memref<1x64xf32, #tpu.memory_space<vmem>>, %arg10: memref<8x64xf32, #tpu.memory_space<vmem>>, %arg11: memref<8x32xf32, #tpu.memory_space<vmem>>) attributes {dimension_semantics = [#tpu.dimension_semantics<parallel>], iteration_bounds = array<i64: 1>, scalar_prefetch = 0 : i64, scratch_operands = 0 : i64, tpu.core_type = #tpu.core_type<tc>, window_params = [{transform_indices = @transform_0, window_bounds = array<i64: 8, 64>}, {pipeline_mode = #tpu.pipeline_mode<synchronous>, transform_indices = @transform_1, window_bounds = array<i64: 64, 256>}, {pipeline_mode = #tpu.pipeline_mode<synchronous>, transform_indices = @transform_2, window_bounds = array<i64: 1, 256>}, {pipeline_mode = #tpu.pipeline_mode<synchronous>, transform_indices = @transform_3, window_bounds = array<i64: 256, 32>}, {pipeline_mode = #tpu.pipeline_mode<synchronous>, transform_indices = @transform_4, window_bounds = array<i64: 1, 32>}, {pipeline_mode = #tpu.pipeline_mode<synchronous>, transform_indices = @transform_5, window_bounds = array<i64: 256, 256>}, {pipeline_mode = #tpu.pipeline_mode<synchronous>, transform_indices = @transform_6, window_bounds = array<i64: 1, 256>}, {pipeline_mode = #tpu.pipeline_mode<synchronous>, transform_indices = @transform_7, window_bounds = array<i64: 256, 64>}, {pipeline_mode = #tpu.pipeline_mode<synchronous>, transform_indices = @transform_8, window_bounds = array<i64: 1, 64>}, {transform_indices = @transform_9, window_bounds = array<i64: 8, 64>}, {transform_indices = @transform_10, window_bounds = array<i64: 8, 32>}]} {
    %c0 = arith.constant 0 : index
    %c0_0 = arith.constant 0 : index
    %0 = vector.load %arg1[%c0, %c0_0] : memref<8x64xbf16, #tpu.memory_space<vmem>>, vector<8x64xbf16>
    %c0_1 = arith.constant 0 : index
    %c0_2 = arith.constant 0 : index
    %1 = vector.load %arg2[%c0_1, %c0_2] : memref<64x256xbf16, #tpu.memory_space<vmem>>, vector<64x256xbf16>
    %cst = arith.constant dense<0.000000e+00> : vector<8x256xf32>
    %2 = tpu.matmul %0, %1, %cst {dimension_numbers = #tpu.dot_dimension_numbers<[1], [0], [0], [1], [0, 0, 1, 1], [], []>} : vector<8x64xbf16>, vector<64x256xbf16>, vector<8x256xf32> -> vector<8x256xf32>
    %c0_3 = arith.constant 0 : index
    %c0_4 = arith.constant 0 : index
    %3 = vector.load %arg3[%c0_3, %c0_4] : memref<1x256xf32, #tpu.memory_space<vmem>>, vector<1x256xf32>
    %4 = vector.broadcast %3 : vector<1x256xf32> to vector<8x256xf32>
    %5 = arith.addf %2, %4 : vector<8x256xf32>
    %cst_5 = arith.constant 0.000000e+00 : f32
    %6 = vector.broadcast %cst_5 : f32 to vector<8x256xf32>
    %7 = arith.maximumf %5, %6 : vector<8x256xf32>
    %8 = arith.truncf %7 : vector<8x256xf32> to vector<8x256xbf16>
    %c0_6 = arith.constant 0 : index
    %c0_7 = arith.constant 0 : index
    %9 = vector.load %arg4[%c0_6, %c0_7] : memref<256x32xbf16, #tpu.memory_space<vmem>>, vector<256x32xbf16>
    %cst_8 = arith.constant dense<0.000000e+00> : vector<8x32xf32>
    %10 = tpu.matmul %8, %9, %cst_8 {dimension_numbers = #tpu.dot_dimension_numbers<[1], [0], [0], [1], [0, 0, 1, 1], [], []>} : vector<8x256xbf16>, vector<256x32xbf16>, vector<8x32xf32> -> vector<8x32xf32>
    %c0_9 = arith.constant 0 : index
    %c0_10 = arith.constant 0 : index
    %11 = vector.load %arg5[%c0_9, %c0_10] : memref<1x32xf32, #tpu.memory_space<vmem>>, vector<1x32xf32>
    %12 = vector.broadcast %11 : vector<1x32xf32> to vector<8x32xf32>
    %13 = arith.addf %10, %12 : vector<8x32xf32>
    %c0_11 = arith.constant 0 : index
    %c0_12 = arith.constant 0 : index
    %14 = vector.load %arg11[%c0_11, %c0_12] : memref<8x32xf32, #tpu.memory_space<vmem>>, vector<8x32xf32>
    tpu.vector_store %arg11[%c0_11, %c0_12], %13 {strides = array<i32>} : memref<8x32xf32, #tpu.memory_space<vmem>>, vector<8x32xf32>,
    %c0_13 = arith.constant 0 : index
    %c0_14 = arith.constant 0 : index
    %15 = vector.load %arg6[%c0_13, %c0_14] : memref<256x256xbf16, #tpu.memory_space<vmem>>, vector<256x256xbf16>
    %cst_15 = arith.constant dense<0.000000e+00> : vector<8x256xf32>
    %16 = tpu.matmul %8, %15, %cst_15 {dimension_numbers = #tpu.dot_dimension_numbers<[1], [0], [0], [1], [0, 0, 1, 1], [], []>} : vector<8x256xbf16>, vector<256x256xbf16>, vector<8x256xf32> -> vector<8x256xf32>
    %c0_16 = arith.constant 0 : index
    %c0_17 = arith.constant 0 : index
    %17 = vector.load %arg7[%c0_16, %c0_17] : memref<1x256xf32, #tpu.memory_space<vmem>>, vector<1x256xf32>
    %18 = vector.broadcast %17 : vector<1x256xf32> to vector<8x256xf32>
    %19 = arith.addf %16, %18 : vector<8x256xf32>
    %cst_18 = arith.constant 0.000000e+00 : f32
    %20 = vector.broadcast %cst_18 : f32 to vector<8x256xf32>
    %21 = arith.maximumf %19, %20 : vector<8x256xf32>
    %22 = arith.truncf %21 : vector<8x256xf32> to vector<8x256xbf16>
    %c0_19 = arith.constant 0 : index
    %c0_20 = arith.constant 0 : index
    %23 = vector.load %arg8[%c0_19, %c0_20] : memref<256x64xbf16, #tpu.memory_space<vmem>>, vector<256x64xbf16>
    %cst_21 = arith.constant dense<0.000000e+00> : vector<8x64xf32>
    %24 = tpu.matmul %22, %23, %cst_21 {dimension_numbers = #tpu.dot_dimension_numbers<[1], [0], [0], [1], [0, 0, 1, 1], [], []>} : vector<8x256xbf16>, vector<256x64xbf16>, vector<8x64xf32> -> vector<8x64xf32>
    %c0_22 = arith.constant 0 : index
    %c0_23 = arith.constant 0 : index
    %25 = vector.load %arg9[%c0_22, %c0_23] : memref<1x64xf32, #tpu.memory_space<vmem>>, vector<1x64xf32>
    %26 = vector.broadcast %25 : vector<1x64xf32> to vector<8x64xf32>
    %27 = arith.addf %24, %26 : vector<8x64xf32>
    %c0_24 = arith.constant 0 : index
    %c0_25 = arith.constant 0 : index
    %28 = vector.load %arg10[%c0_24, %c0_25] : memref<8x64xf32, #tpu.memory_space<vmem>>, vector<8x64xf32>
    tpu.vector_store %arg10[%c0_24, %c0_25], %27 {strides = array<i32>} : memref<8x64xf32, #tpu.memory_space<vmem>>, vector<8x64xf32>,
    return
  }
  func.func @transform_0(%arg0: i32) -> (i32, i32) {
    %c0_i32 = arith.constant 0 : i32
    %c0_i32_0 = arith.constant 0 : i32
    return %arg0, %c0_i32 : i32, i32
  }
  func.func @transform_1(%arg0: i32) -> (i32, i32) {
    %c0_i32 = arith.constant 0 : i32
    %c0_i32_0 = arith.constant 0 : i32
    %c0_i32_1 = arith.constant 0 : i32
    return %c0_i32, %c0_i32_0 : i32, i32
  }
  func.func @transform_2(%arg0: i32) -> (i32, i32) {
    %c0_i32 = arith.constant 0 : i32
    %c0_i32_0 = arith.constant 0 : i32
    %c0_i32_1 = arith.constant 0 : i32
    return %c0_i32, %c0_i32_0 : i32, i32
  }
  func.func @transform_3(%arg0: i32) -> (i32, i32) {
    %c0_i32 = arith.constant 0 : i32
    %c0_i32_0 = arith.constant 0 : i32
    %c0_i32_1 = arith.constant 0 : i32
    return %c0_i32, %c0_i32_0 : i32, i32
  }
  func.func @transform_4(%arg0: i32) -> (i32, i32) {
    %c0_i32 = arith.constant 0 : i32
    %c0_i32_0 = arith.constant 0 : i32
    %c0_i32_1 = arith.constant 0 : i32
    return %c0_i32, %c0_i32_0 : i32, i32
  }
  func.func @transform_5(%arg0: i32) -> (i32, i32) {
    %c0_i32 = arith.constant 0 : i32
    %c0_i32_0 = arith.constant 0 : i32
    %c0_i32_1 = arith.constant 0 : i32
    return %c0_i32, %c0_i32_0 : i32, i32
  }
  func.func @transform_6(%arg0: i32) -> (i32, i32) {
    %c0_i32 = arith.constant 0 : i32
    %c0_i32_0 = arith.constant 0 : i32
    %c0_i32_1 = arith.constant 0 : i32
    return %c0_i32, %c0_i32_0 : i32, i32
  }
  func.func @transform_7(%arg0: i32) -> (i32, i32) {
    %c0_i32 = arith.constant 0 : i32
    %c0_i32_0 = arith.constant 0 : i32
    %c0_i32_1 = arith.constant 0 : i32
    return %c0_i32, %c0_i32_0 : i32, i32
  }
  func.func @transform_8(%arg0: i32) -> (i32, i32) {
    %c0_i32 = arith.constant 0 : i32
    %c0_i32_0 = arith.constant 0 : i32
    %c0_i32_1 = arith.constant 0 : i32
    return %c0_i32, %c0_i32_0 : i32, i32
  }
  func.func @transform_9(%arg0: i32) -> (i32, i32) {
    %c0_i32 = arith.constant 0 : i32
    %c0_i32_0 = arith.constant 0 : i32
    return %arg0, %c0_i32 : i32, i32
  }
  func.func @transform_10(%arg0: i32) -> (i32, i32) {
    %c0_i32 = arith.constant 0 : i32
    %c0_i32_0 = arith.constant 0 : i32
    return %arg0, %c0_i32 : i32, i32
  }
}

</mosaic_0001>

<bundles_post_ra>
// kernel: vae_forward.1
= control target key start
LH: loop header
LB: loop body
LE: loop exit
PB: predicated region body
PF: predicated region fallthrough
CT: control target
= control target key end

     0   :  { %v1001_v2 = vmov 0   ;;  %vm97_vm0 = vcmask 523264   ;;  %s1297_s0 = inlined_call_operand.vmem [shape: bf16[8,64], index: 0, kind: input, shape index: {}]   ;;  %s1298_s1 = inlined_call_operand.vmem [shape: bf16[64,256], index: 1, kind: input, shape index: {}]   ;;  %s1299_s2 = inlined_call_operand.vmem [shape: f32[1,256], index: 2, kind: input, shape index: {}]   ;;  %s1300_s3 = inlined_call_operand.vmem [shape: bf16[256,32], index: 3, kind: input, shape index: {}]   ;;  %s1301_s4 = inlined_call_operand.vmem [shape: f32[1,32], index: 4, kind: input, shape index: {}]   ;;  %s1302_s5 = inlined_call_operand.vmem [shape: bf16[256,256], index: 5, kind: input, shape index: {}]   ;;  %s1303_s6 = inlined_call_operand.vmem [shape: f32[1,256], index: 6, kind: input, shape index: {}]   ;;  %s1304_s7 = inlined_call_operand.vmem [shape: bf16[256,64], index: 7, kind: input, shape index: {}]   ;;  %s1305_s8 = inlined_call_operand.vmem [shape: f32[1,64], index: 8, kind: input, shape index: {}]   ;;  %s1306_s9 = inlined_call_operand.hbm [shape: f32[8,64], index: 9, kind: output, shape index: {0}]   ;;  %s1307_s10 = inlined_call_operand.vmem [shape: f32[8,32], index: 10, kind: output, shape index: {1}]  }
   0x1   :  { %v887_v0 = vld [vmem:[%s1298_s1 + $0x34] ss:$8 sps:$4 sm:$0xff]   ;;  %v889_v1 = vld [vmem:[%s1298_s1 + $0x30] ss:$8 sps:$4 sm:$0xff]   ;;  %133 = vmatprep.mubr.bf16.mxu0 %v1001_v2  ;;  %v890_v3 = vld [vmem:[%s1298_s1 + $0x24] ss:$8 sps:$4 sm:$0xff]  }
   0x2   :  { %109 = vmatprep.subr.bf16.mxu0 %v887_v0  ;;  %v892_v4 = vld [vmem:[%s1298_s1 + $0x20] ss:$8 sps:$4 sm:$0xff]   ;;  %v893_v5 = vld [vmem:[%s1298_s1 + $0x14] ss:$8 sps:$4 sm:$0xff]   ;;  %v895_v6 = vld [vmem:[%s1298_s1 + $0x10] ss:$8 sps:$4 sm:$0xff]  }
   0x3   :  { %110 = vmatpush1.bf16.msra.mxu0 %v889_v1  ;;  %v896_v7 = vld [vmem:[%s1298_s1 + $0x4] ss:$8 sps:$4 sm:$0xff]   ;;  %v898_v8 = vld [vmem:[%s1298_s1] ss:$8 sps:$4 sm:$0xff]   ;;  %v901_v9 = vld [vmem:[%s1302_s5 + $0x74] ss:$8 sps:$4 sm:$0xff]  }
   0x4   :  { %111 = vmatprep.subr.bf16.mxu0 %v890_v3  ;;  %v36_v10 = vld [vmem:[%s1297_s0] sm:$0xf]  ;;  %v899_v11 = vld [vmem:[%s1302_s5 + $0x70] ss:$8 sps:$4 sm:$0xff]   ;;  %v904_v12 = vld [vmem:[%s1302_s5 + $0x64] ss:$8 sps:$4 sm:$0xff]  }
   0x5   :  { %v923_v13 = vld [vmem:[%s1300_s3 + $0x78] sm:$0xff]   ;;  %v902_v14 = vld [vmem:[%s1302_s5 + $0x60] ss:$8 sps:$4 sm:$0xff]   ;;  %v928_v17 = vld [vmem:[%s1300_s3 + $0x70] sm:$0xff]  }
   0x6   :  { %v907_v15 = vld [vmem:[%s1302_s5 + $0x54] ss:$8 sps:$4 sm:$0xff]   ;;  %841 = vmatprep.subr.bf16.mxu1 %v923_v13  ;;  %v905_v18 = vld [vmem:[%s1302_s5 + $0x50] ss:$8 sps:$4 sm:$0xff]   ;;  %v933_v20 = vld [vmem:[%s1300_s3 + $0x68] sm:$0xff]  }
   0x7   :  { %112 = vmatpush1.bf16.msra.mxu0 %v892_v4  ;;  %v927_v16 = vld [vmem:[%s1300_s3 + $0x38] sm:$0xff]   ;;  %v932_v19 = vld [vmem:[%s1300_s3 + $0x30] sm:$0xff]   ;;  %v910_v21 = vld [vmem:[%s1302_s5 + $0x44] ss:$8 sps:$4 sm:$0xff]  }
   0x8   :  { %113 = vmatprep.subr.bf16.mxu0 %v893_v5  ;;  %842 = vmatpush3.bf16.msra.mxu1 %v927_v16  ;;  %v908_v22 = vld [vmem:[%s1302_s5 + $0x40] ss:$8 sps:$4 sm:$0xff]   ;;  %v913_v25 = vld [vmem:[%s1302_s5 + $0x34] ss:$8 sps:$4 sm:$0xff]   ;;  %v911_v28 = vld [vmem:[%s1302_s5 + $0x30] ss:$8 sps:$4 sm:$0xff]  }
   0x9   :  { %843 = vmatprep.subr.bf16.mxu1 %v928_v17  ;;  %v937_v23 = vld [vmem:[%s1300_s3 + $0x28] sm:$0xff]   ;;  %v938_v24 = vld [vmem:[%s1300_s3 + $0x60] sm:$0xff]   ;;  %v943_v27 = vld [vmem:[%s1300_s3 + $0x58] sm:$0xff]  }
   0xa   :  { %v942_v26 = vld [vmem:[%s1300_s3 + $0x20] sm:$0xff]   ;;  %v947_v30 = vld [vmem:[%s1300_s3 + $0x18] sm:$0xff]   ;;  %v948_v31 = vld [vmem:[%s1300_s3 + $0x50] sm:$0xff]  }
   0xb   :  { %114 = vmatpush1.bf16.msra.mxu0 %v895_v6  ;;  %v916_v29 = vld [vmem:[%s1302_s5 + $0x24] ss:$8 sps:$4 sm:$0xff]   ;;  %v914_v32 = vld [vmem:[%s1302_s5 + $0x20] ss:$8 sps:$4 sm:$0xff]   ;;  %v919_v33 = vld [vmem:[%s1302_s5 + $0x14] ss:$8 sps:$4 sm:$0xff]  }
   0xc   :  { %115 = vmatprep.subr.bf16.mxu0 %v896_v7  ;;  %844 = vmatpush3.bf16.msra.mxu1 %v932_v19  ;;  %v952_v34 = vld [vmem:[%s1300_s3 + $0x10] sm:$0xff]   ;;  %v922_v36 = vld [vmem:[%s1302_s5 + $0x4] ss:$8 sps:$4 sm:$0xff]   ;;  %v920_v37 = vld [vmem:[%s1302_s5] ss:$8 sps:$4 sm:$0xff]  }
   0xd   :  { %845 = vmatprep.subr.bf16.mxu1 %v933_v20  ;;  %v917_v35 = vld [vmem:[%s1302_s5 + $0x10] ss:$8 sps:$4 sm:$0xff]   ;;  %v926_v38 = vld [vmem:[%s1302_s5 + $0xf4] ss:$8 sps:$4 sm:$0xff]   ;;  %v931_v40 = vld [vmem:[%s1302_s5 + $0xe4] ss:$8 sps:$4 sm:$0xff]  }
   0xe   :  { %v924_v39 = vld [vmem:[%s1302_s5 + $0xf0] ss:$8 sps:$4 sm:$0xff]   ;;  %v929_v41 = vld [vmem:[%s1302_s5 + $0xe0] ss:$8 sps:$4 sm:$0xff]  }
   0xf   :  { %116 = vmatpush1.bf16.msra.mxu0 %v898_v8 }
  0x10   :  { %527 = vmatprep.subr.bf16.mxu0 %v901_v9  ;;  %846 = vmatpush3.bf16.msra.mxu1 %v937_v23 }
  0x11   :  { %847 = vmatprep.subr.bf16.mxu1 %v938_v24 }
  0x12   :  { %774 = vmatmul.mubr.msk.bf16.vlgmr.msra.gmra.mxu0 %vm97_vm0, %v36_v10 }
  0x13   :  { %528 = vmatpush1.bf16.msra.mxu0 %v899_v11 }
  0x14   :  { %529 = vmatprep.subr.bf16.mxu0 %v904_v12  ;;  %848 = vmatpush3.bf16.msra.mxu1 %v942_v26 }
  0x15   :  { %849 = vmatprep.subr.bf16.mxu1 %v943_v27 }
  0x17   :  { %530 = vmatpush1.bf16.msra.mxu0 %v902_v14 }
  0x18   :  { %531 = vmatprep.subr.bf16.mxu0 %v907_v15  ;;  %850 = vmatpush3.bf16.msra.mxu1 %v947_v30 }
  0x19   :  { %851 = vmatprep.subr.bf16.mxu1 %v948_v31 }
  0x1b   :  { %532 = vmatpush1.bf16.msra.mxu0 %v905_v18 }
  0x1c   :  { %533 = vmatprep.subr.bf16.mxu0 %v910_v21  ;;  %852 = vmatpush3.bf16.msra.mxu1 %v952_v34 }
  0x1f   :  { %534 = vmatpush1.bf16.msra.mxu0 %v908_v22 }
  0x20   :  { %535 = vmatprep.subr.bf16.mxu0 %v913_v25 }
  0x23   :  { %536 = vmatpush1.bf16.msra.mxu0 %v911_v28 }
  0x24   :  { %537 = vmatprep.subr.bf16.mxu0 %v916_v29 }
  0x27   :  { %538 = vmatpush1.bf16.msra.mxu0 %v914_v32 }
  0x28   :  { %539 = vmatprep.subr.bf16.mxu0 %v919_v33 }
  0x2b   :  { %540 = vmatpush1.bf16.msra.mxu0 %v917_v35 }
  0x2c   :  { %541 = vmatprep.subr.bf16.mxu0 %v922_v36 }
  0x2f   :  { %542 = vmatpush1.bf16.msra.mxu0 %v920_v37 }
  0x30   :  { %543 = vmatprep.subr.bf16.mxu0 %v926_v38 }
  0x33   :  { %544 = vmatpush2.bf16.msra.mxu0 %v924_v39 }
  0x34   :  { %16 = vsyncpa [#allocation3], 0  ;;  %545 = vmatprep.subr.bf16.mxu0 %v931_v40  ;;  %v936_v42 = vld [vmem:[%s1302_s5 + $0xd4] ss:$8 sps:$4 sm:$0xff]   ;;  %v934_v43 = vld [vmem:[%s1302_s5 + $0xd0] ss:$8 sps:$4 sm:$0xff]   ;;  %v47_v59 = vlaneseq }
  0x35   :  { %v941_v44 = vld [vmem:[%s1302_s5 + $0xc4] ss:$8 sps:$4 sm:$0xff]   ;;  %v939_v45 = vld [vmem:[%s1302_s5 + $0xc0] ss:$8 sps:$4 sm:$0xff]   ;;  %v946_v46 = vld [vmem:[%s1302_s5 + $0xb4] ss:$8 sps:$4 sm:$0xff]  }
  0x36   :  { %v944_v47 = vld [vmem:[%s1302_s5 + $0xb0] ss:$8 sps:$4 sm:$0xff]   ;;  %v951_v48 = vld [vmem:[%s1302_s5 + $0xa4] ss:$8 sps:$4 sm:$0xff]   ;;  %v949_v49 = vld [vmem:[%s1302_s5 + $0xa0] ss:$8 sps:$4 sm:$0xff]  }
  0x37   :  { %546 = vmatpush2.bf16.msra.mxu0 %v929_v41  ;;  %v953_v50 = vld [vmem:[%s1300_s3 + $0x48] sm:$0xff]   ;;  %v956_v51 = vld [vmem:[%s1302_s5 + $0x94] ss:$8 sps:$4 sm:$0xff]   ;;  %v954_v52 = vld [vmem:[%s1302_s5 + $0x90] ss:$8 sps:$4 sm:$0xff]   ;;  %v48_v60 = vshrl.u32 %v47_v59, 7 }
  0x38   :  { %547 = vmatprep.subr.bf16.mxu0 %v936_v42  ;;  %v957_v53 = vld [vmem:[%s1300_s3 + $0x8] sm:$0xff]   ;;  %853 = vmatprep.subr.bf16.mxu1 %v953_v50  ;;  %v958_v54 = vld [vmem:[%s1300_s3 + $0x40] sm:$0xff]   ;;  %v963_v58 = vld [vmem:[%s1304_s7 + $0x78] sm:$0xff]   ;;  %vm321_vm1 = vcmask 261120   ;;  %s1002_s28 = smov [#allocation2]  }
  0x39   :  { %854 = vmatpush3.bf16.msra.mxu1 %v957_v53  ;;  %v961_v55 = vld [vmem:[%s1302_s5 + $0x84] ss:$8 sps:$4 sm:$0xff]   ;;  %v959_v56 = vld [vmem:[%s1302_s5 + $0x80] ss:$8 sps:$4 sm:$0xff]   ;;  %v49_v61 = vsub.s32 0, %v48_v60  ;;  %v53_v63 = vsub.s32 1, %v48_v60 }
  0x3a   :  { %v962_v57 = vld [vmem:[%s1300_s3] sm:$0xff]   ;;  %855 = vmatprep.subr.bf16.mxu1 %v958_v54  ;;  %v964_v11 = vld [vmem:[%s1304_s7 + $0x38] sm:$0xff]   ;;  %v965_v13 = vld [vmem:[%s1304_s7 + $0x70] sm:$0xff]   ;;  %s754_s29 = sshll.u32 %s1002_s28, 4  ;;  %s755_s29 = int_to_ptr.vmem [resolvable:$true] %s754_s29 }
  0x3b   :  { %548 = vmatpush2.bf16.msra.mxu0 %v934_v43  ;;  %v45_v62 = vld [vmem:[%s1299_s2] sm:$0x3]  ;;  %v966_v14 = vld [vmem:[%s1304_s7 + $0x30] sm:$0xff]   ;;  %v967_v15 = vld [vmem:[%s1304_s7 + $0x68] sm:$0xff]   ;;  %p984_p1 = scmp.lt.s32.totalorder %s755_s29, %s755_s29 }
  0x3c   :  { %549 = vmatprep.subr.bf16.mxu0 %v941_v44  ;;  %v50_v0 = vrot.slane %v45_v62, %v49_v61  ;;  %v54_v1 = vrot.slane %v45_v62, %v53_v63  ;;  %v968_v16 = vld [vmem:[%s1304_s7 + $0x28] sm:$0xff]   ;;  %v969_v17 = vld [vmem:[%s1304_s7 + $0x60] sm:$0xff]   ;;  %v971_v19 = vld [vmem:[%s1304_s7 + $0x58] sm:$0xff]  }
  0x3d   :  { %856 = vmatpush3.bf16.msra.mxu1 %v962_v57  ;;  %v970_v18 = vld [vmem:[%s1304_s7 + $0x20] sm:$0xff]   ;;  %v972_v20 = vld [vmem:[%s1304_s7 + $0x18] sm:$0xff]   ;;  %v973_v21 = vld [vmem:[%s1304_s7 + $0x50] sm:$0xff]  }
  0x3e   :  { %863 = vmatprep.subr.bf16.mxu1 %v963_v58  ;;  %v974_v22 = vld [vmem:[%s1304_s7 + $0x10] sm:$0xff]   ;;  %v975_v23 = vld [vmem:[%s1304_s7 + $0x48] sm:$0xff]   ;;  %v977_v25 = vld [vmem:[%s1304_s7 + $0x40] sm:$0xff]  }
  0x3f   :  { %550 = vmatpush2.bf16.msra.mxu0 %v939_v45  ;;  %v976_v24 = vld [vmem:[%s1304_s7 + $0x8] sm:$0xff]   ;;  %v978_v26 = vld [vmem:[%s1304_s7] sm:$0xff]  }
  0x40   :  { %551 = vmatprep.subr.bf16.mxu0 %v946_v46  ;;  %v355_v27 = vld [vmem:[%s1303_s6] sm:$0x3] }
  0x41   :  { %v360_v28 = vrot.slane %v355_v27, %v49_v61  ;;  %v364_v29 = vrot.slane %v355_v27, %v53_v63  ;;  %v775_v33 = vld [vmem:[%s1301_s4] ss:$0 sm:$0xff] }
  0x43   :  { %552 = vmatpush2.bf16.msra.mxu0 %v944_v47 }
  0x44   :  { %553 = vmatprep.subr.bf16.mxu0 %v951_v48  ;;  %v824_v48 = vld [vmem:[%s1305_s8] ss:$0 sm:$0xff] }
  0x47   :  { %554 = vmatpush2.bf16.msra.mxu0 %v949_v49 }
  0x48   :  { %555 = vmatprep.subr.bf16.mxu0 %v956_v51 }
  0x4b   :  { %556 = vmatpush2.bf16.msra.mxu0 %v954_v52 }
  0x4c   :  { %557 = vmatprep.subr.bf16.mxu0 %v961_v55 }
  0x4f   :  { %558 = vmatpush2.bf16.msra.mxu0 %v959_v56 }
  0xd2   :  { %v135_v2 = vpop.f32.mrf.mxu0 }
  0xd3   :  { %v136_v3 = vadd.f32 %v135_v2, %v50_v0 }
  0xd4   :  { %v137_v4 = vpop.f32.mrf.mxu0 }
  0xd5   :  { %v138_v5 = vadd.f32 %v137_v4, %v54_v1  ;;  %v142_v6 = vmax.f32 %v136_v3, 0.0 }
  0xd6   :  { %v139_v7 = vpop.f32.mrf.mxu0 }
  0xd7   :  { %v143_v8 = vmax.f32 %v138_v5, 0.0  ;;  %v144_v12 = vpack.c.bf16 %v142_v6, %v142_v6 }
  0xd8   :  { %v140_v9 = vpop.f32.mrf.mxu0 }
  0xd9   :  { %v145_v10 = vpack.c.bf16 %v143_v8, %v143_v8 }
  0xdb   :  { %313 = vmatprep.mubr.bf16.mxu1 %v145_v10  ;;  %559 = vmatprep.mubr.bf16.mxu0 %v145_v10 }
  0xdc   :  { %314 = vmatmul.mubr.bf16.vlgmr.msra.gmra.mxu1 %v144_v12  ;;  %560 = vmatmul.mubr.bf16.vlgmr.msra.gmra.mxu0 %v144_v12 }
  0xdd   :  { %864 = vmatpush3.bf16.msra.mxu1 %v964_v11 }
  0xde   :  { %865 = vmatprep.subr.bf16.mxu1 %v965_v13 }
  0xe1   :  { %866 = vmatpush3.bf16.msra.mxu1 %v966_v14 }
  0xe2   :  { %867 = vmatprep.subr.bf16.mxu1 %v967_v15 }
  0xe5   :  { %868 = vmatpush3.bf16.msra.mxu1 %v968_v16 }
  0xe6   :  { %869 = vmatprep.subr.bf16.mxu1 %v969_v17 }
  0xe9   :  { %870 = vmatpush3.bf16.msra.mxu1 %v970_v18 }
  0xea   :  { %871 = vmatprep.subr.bf16.mxu1 %v971_v19 }
  0xed   :  { %872 = vmatpush3.bf16.msra.mxu1 %v972_v20 }
  0xee   :  { %873 = vmatprep.subr.bf16.mxu1 %v973_v21 }
  0xf1   :  { %874 = vmatpush3.bf16.msra.mxu1 %v974_v22 }
  0xf2   :  { %875 = vmatprep.subr.bf16.mxu1 %v975_v23 }
  0xf5   :  { %876 = vmatpush3.bf16.msra.mxu1 %v976_v24 }
  0xf6   :  { %877 = vmatprep.subr.bf16.mxu1 %v977_v25 }
  0xf9   :  { %878 = vmatpush3.bf16.msra.mxu1 %v978_v26 }
 0x19c   :  { %v857_v30 = vpop.f32.mrf.mxu1  ;;  %v561_v31 = vpop.f32.mrf.mxu0 }
 0x19d   :  { %v562_v32 = vadd.f32 %v561_v31, %v360_v28 }
 0x19e   :  { %v858_v34 = vpop.f32.mrf.mxu1  ;;  %v563_v35 = vpop.f32.mrf.mxu0 }
 0x19f   :  { %v859_v36 = vadd.f32 %v858_v34, %v857_v30  ;;  %v564_v37 = vadd.f32 %v563_v35, %v364_v29  ;;  %v568_v38 = vmax.f32 %v562_v32, 0.0 }
 0x1a0   :  { %v860_v39 = vpop.f32.mrf.mxu1  ;;  %v565_v40 = vpop.f32.mrf.mxu0 }
 0x1a1   :  { %v316_v41 = vadd.f32 %v859_v36, %v775_v33  ;;  %v569_v42 = vmax.f32 %v564_v37, 0.0  ;;  %v570_v46 = vpack.c.bf16 %v568_v38, %v568_v38 }
 0x1a2   :  { %v861_v43 = vpop.f32.mrf.mxu1  ;;  %v566_v44 = vpop.f32.mrf.mxu0 }
 0x1a3   :  { %322 = vst.msk [vmem:[%s1307_s10] sm:$0xff] %vm321_vm1, %v316_v41  ;;  %v571_v45 = vpack.c.bf16 %v569_v42, %v569_v42  ;;  %s979_s10 = scalar_lea.vmem %s755_s29, 128 }
 0x1a4   :  { %p980_p0 = scmp.ne.s32.totalorder %s755_s29, %s979_s10  ;;  %p985_p2 = scmp.lt.s32.totalorder %s979_s10, %s979_s10 }
 0x1a5   :  { %739 = vmatprep.mubr.bf16.mxu1 %v571_v45 }
 0x1a6   :  { %740 = vmatmul.mubr.bf16.vlgmr.msra.gmra.mxu1 %v570_v46  ;;  %p986_p3 = por %p985_p2, %p984_p1 }
 0x1a8   :  { %p987_p4 = pnand %p986_p3, %p980_p0 }
 0x266   :  { %v879_v47 = vpop.f32.mrf.mxu1 }
 0x268   :  { %v880_v49 = vpop.f32.mrf.mxu1 }
 0x269   :  { %v881_v50 = vadd.f32 %v880_v49, %v879_v47 }
 0x26a   :  { %v882_v51 = vpop.f32.mrf.mxu1 }
 0x26b   :  { %v742_v52 = vadd.f32 %v881_v50, %v824_v48 }
 0x26c   :  { %v883_v53 = vpop.f32.mrf.mxu1 }
 0x26d   :  { %747 = vst.msk [vmem:[#allocation2] sm:$0xff] %vm97_vm0, %v742_v52 }
 0x26e   :  { %990 = shalt.err (!%p987_p4)
}
 0x26f   :  { %757 = dma.vmem_to_hbm [thread:$0]  %s755_s29, 128, %s1306_s9, [#allocation3]  }
 0x270   :  { %999 = dma.done.wait [#allocation3], 128  }
 0x271   :  { %1000 = vsyncadd [#allocation3], 4294967168 }
 0x272   :  { %765 = vsyncpa [#allocation3], 1 }

</bundles_post_ra>
